<compile_context>
chip_gen: v6e
topology: v6e:2x2x1
jax: 0.10.0
libtpu: 0.0.40
codegen_flags: <defaults>
</compile_context>

<pallas_src>
import functools

import jax
import jax.numpy as jnp
from jax.experimental import pallas as pl
from jax.experimental.pallas import tpu as pltpu


def _round_up(v, m):
    return ((v + m - 1) // m) * m


def _has_bf16_vpu():
    """v6e/v7x VPUs have bf16 ALUs; v5e (and older) do not."""
    try:
        kind = jax.devices()[0].device_kind.lower()
    except Exception:  # pragma: no cover - defensive
        return True
    return ("v6" in kind) or ("v7" in kind)


def _gsa_kernel(batch_ref, pts_ref, w1_ref, w2_ref, b2_ref,
                pooled_ref, cnt_ref, *, bf16_epilogue):
    j = pl.program_id(1)  # inner (reduction) axis over N-tiles

    @pl.when(j == 0)
    def _():
        pooled_ref[...] = jnp.zeros_like(pooled_ref)
        cnt_ref[...] = jnp.zeros_like(cnt_ref)

    # ---- Layer 1: single dot on packed [x | pos | 1] (bias rides inside the matmul) --
    if bf16_epilogue:
        h = jnp.dot(pts_ref[...], w1_ref[...], preferred_element_type=jnp.bfloat16)
        h = jnp.maximum(h, 0)                          # bf16 ReLU (v6e/v7x bf16 VPU)
    else:
        h = jnp.dot(pts_ref[...], w1_ref[...], preferred_element_type=jnp.float32)
        h = jnp.maximum(h, 0.0).astype(jnp.bfloat16)   # f32 epilogue (v5e has no bf16 VPU)

    # ---- Layer 2: bf16 MXU, f32 accumulation, f32 bias + ReLU ----
    g = jnp.dot(h, w2_ref[...], preferred_element_type=jnp.float32)
    g = jnp.maximum(g + b2_ref[...], 0.0)              # [tile_n, H2_pad] f32

    # ---- Segment one-hot built in-kernel (padding rows carry id -1 -> match nothing) --
    b_pad = pooled_ref.shape[0]
    tile_n = batch_ref.shape[1]
    seg = jax.lax.broadcasted_iota(jnp.int32, (b_pad, tile_n), 0)
    mask = seg == batch_ref[...]                       # [B_pad, tile_n] bool

    if bf16_epilogue:
        # v6e/v7x: MXU has slack vs the VPU here; f32 pooling dot removes a
        # (tile_n x H2_pad) VPU cast and improves pooled-mean precision.
        pooled_ref[...] += jnp.dot(mask.astype(jnp.float32), g,
                                   preferred_element_type=jnp.float32)
    else:
        # v5e: keep MXU operands bf16 (much less MXU headroom on this generation).
        pooled_ref[...] += jnp.dot(mask.astype(jnp.bfloat16), g.astype(jnp.bfloat16),
                                   preferred_element_type=jnp.float32)

    # ---- Segment counts in-kernel (XLU lane reduce): no wrapper scatter-add over N ----
    cnt_ref[...] += jnp.sum(mask.astype(jnp.float32), axis=1, keepdims=True)


def global_sa_module(x, pos, batch, params, num_batches, *, tile_n=2048, ncores=2):
    """Forward pass of GlobalSAModule. Returns (x_pooled, pos_zeros, batch_arange)."""
    w1, b1, w2, b2 = params
    n, c = x.shape
    h1 = w1.shape[1]
    h2 = w2.shape[1]
    assert w1.shape[0] == c + 3

    bf16_epilogue = _has_bf16_vpu()

    # ---- TPU-friendly shapes: lane dims multiples of 128, sublane multiples of 8 ----
    b_pad = _round_up(max(num_batches, 1), 8)
    h1_pad = _round_up(h1, 128)
    h2_pad = _round_up(h2, 128)
    cp = _round_up(c + 3 + 1, 8)                       # packed [x | pos | 1] width

    tile_n = max(128, (tile_n // 128) * 128)           # keep tile a multiple of 128
    tile_n = min(tile_n, _round_up(max(n, 1), 128))    # don't over-tile tiny inputs
    tiles_total = max(1, -(-n // tile_n))
    tiles_per_core = -(-tiles_total // ncores)
    n_pad = ncores * tiles_per_core * tile_n

    # ---- packed bf16 point stream; padded rows stay zero with batch id -1 ----
    pts = jnp.zeros((n_pad, cp), jnp.bfloat16)
    pts = pts.at[:n, :c].set(x.astype(jnp.bfloat16))
    pts = pts.at[:n, c:c + 3].set(pos.astype(jnp.bfloat16))
    pts = pts.at[:, c + 3].set(1.0)                    # ones column carries the b1 bias
    batch_p = jnp.full((1, n_pad), -1, jnp.int32).at[0, :n].set(batch.astype(jnp.int32))

    # ---- weights: [w1_x ; w1_pos ; b1] stacked (fuses the concat AND the bias add) ----
    w1p = jnp.zeros((cp, h1_pad), jnp.bfloat16)
    w1p = w1p.at[:c + 3, :h1].set(w1.astype(jnp.bfloat16))
    w1p = w1p.at[c + 3, :h1].set(b1.astype(jnp.bfloat16))
    w2p = jnp.zeros((h1_pad, h2_pad), jnp.bfloat16).at[:h1, :h2].set(w2.astype(jnp.bfloat16))
    b2p = jnp.zeros((1, h2_pad), jnp.float32).at[0, :h2].set(b2.astype(jnp.float32))

    cost = pl.CostEstimate(
        flops=2 * n_pad * (cp * h1_pad + h1_pad * h2_pad + b_pad * h2_pad),
        transcendentals=0,
        bytes_accessed=(n_pad * cp * 2 + n_pad * 4                     # points + ids
                        + (cp * h1_pad + h1_pad * h2_pad) * 2 + h2_pad * 4  # weights
                        + ncores * (b_pad * h2_pad + b_pad) * 4),           # outputs
    )

    kernel = functools.partial(_gsa_kernel, bf16_epilogue=bf16_epilogue)

    pooled, counts = pl.pallas_call(
        kernel,
        out_shape=(jax.ShapeDtypeStruct((ncores, b_pad, h2_pad), jnp.float32),
                   jax.ShapeDtypeStruct((ncores, b_pad, 1), jnp.float32)),
        grid_spec=pltpu.PrefetchScalarGridSpec(
            num_scalar_prefetch=0,
            grid=(ncores, tiles_per_core),             # (parallel cores, N-tile reduction)
            in_specs=[
                # batch ids for this tile
                pl.BlockSpec((1, tile_n), lambda cc, j: (0, cc * tiles_per_core + j)),
                # packed point tile [x | pos | 1]
                pl.BlockSpec((tile_n, cp), lambda cc, j: (cc * tiles_per_core + j, 0)),
                # VMEM-resident weights / bias
                pl.BlockSpec((cp, h1_pad), lambda cc, j: (0, 0)),
                pl.BlockSpec((h1_pad, h2_pad), lambda cc, j: (0, 0)),
                pl.BlockSpec((1, h2_pad), lambda cc, j: (0, 0)),
            ],
            out_specs=[
                # per-core accumulator slabs (same block across the reduction axis)
                pl.BlockSpec((None, b_pad, h2_pad), lambda cc, j: (cc, 0, 0)),
                pl.BlockSpec((None, b_pad, 1), lambda cc, j: (cc, 0, 0)),
            ],
        ),
        compiler_params=pltpu.CompilerParams(
            dimension_semantics=("parallel", "arbitrary"),
            vmem_limit_bytes=32 * 1024 * 1024,
        ),
        cost_estimate=cost,
    )(batch_p, pts, w1p, w2p, b2p)

    # Merge the per-core slabs and apply the mean (tiny [B, H2] wrapper ops).
    pooled = pooled.sum(axis=0)[:num_batches, :h2]
    counts = counts.sum(axis=0)[:num_batches, 0]
    x_out = pooled / jnp.maximum(counts, 1.0)[:, None]

    pos_out = jnp.zeros((num_batches, 3), dtype=pos.dtype)
    batch_out = jnp.arange(num_batches, dtype=jnp.int32)
    return x_out, pos_out, batch_out


def _init_params(key, c_in, h1, h2):
    k1, k2, k3, k4 = jax.random.split(key, 4)
    w1 = jax.random.normal(k1, (c_in, h1), jnp.float32) * 0.1
    b1 = jax.random.normal(k2, (h1,), jnp.float32) * 0.01
    w2 = jax.random.normal(k3, (h1, h2), jnp.float32) * 0.1
    b2 = jax.random.normal(k4, (h2,), jnp.float32) * 0.01
    return w1, b1, w2, b2


def _reference(x, pos, batch, params, num_batches):
    w1, b1, w2, b2 = params
    xp = jnp.concatenate([x, pos], axis=1)
    h = jnp.maximum(xp @ w1 + b1, 0.0)
    h = jnp.maximum(h @ w2 + b2, 0.0)
    onehot = (jnp.arange(num_batches)[:, None] == batch[None, :]).astype(jnp.float32)
    counts = jnp.maximum(onehot.sum(1, keepdims=True), 1.0)
    return (onehot @ h) / counts


if __name__ == "__main__":
    key = jax.random.PRNGKey(0)
    kx, kp, kw = jax.random.split(key, 3)

    B = 2          # number of graphs / batches
    P = 8          # points per graph
    N = B * P      # total points
    C = 4          # input feature channels
    H1, H2 = 32, 32

    x = jax.random.normal(kx, (N, C), jnp.float32)
    pos = jax.random.normal(kp, (N, 3), jnp.float32)
    batch = jnp.repeat(jnp.arange(B, dtype=jnp.int32), P)

    params = _init_params(kw, C + 3, H1, H2)

    out_x, out_pos, out_batch = global_sa_module(x, pos, batch, params, B)
    jax.block_until_ready((out_x, out_pos, out_batch))

    ref = _reference(x, pos, batch, params, B)
    assert out_x.shape == (B, H2)
    assert out_pos.shape == (B, 3)
    assert out_batch.shape == (B,)
    # bf16 MXU inputs (and bf16 b1 folded into the packed weight) with f32 accumulation.
    assert jnp.allclose(out_x, ref, atol=2e-2, rtol=2e-2)
    assert jnp.all(out_pos == 0)
    assert jnp.all(out_batch == jnp.arange(B))

    print("KERNEL_OK")
</pallas_src>

<mosaic_0001>
module attributes {stable_mosaic.version = 11 : i64} {
  func.func @_gsa_kernel(%arg0: i32, %arg1: i32, %arg2: memref<1x128xi32, #tpu.memory_space<vmem>>, %arg3: memref<128x8xbf16, #tpu.memory_space<vmem>>, %arg4: memref<8x128xbf16, #tpu.memory_space<vmem>>, %arg5: memref<128x128xbf16, #tpu.memory_space<vmem>>, %arg6: memref<1x128xf32, #tpu.memory_space<vmem>>, %arg7: memref<1x8x128xf32, #tpu.memory_space<vmem>>, %arg8: memref<1x8x1xf32, #tpu.memory_space<vmem>>) attributes {dimension_semantics = [#tpu.dimension_semantics<parallel>, #tpu.dimension_semantics<arbitrary>], iteration_bounds = array<i64: 2, 1>, scalar_prefetch = 0 : i64, scratch_operands = 0 : i64, tpu.core_type = #tpu.core_type<tc>, window_params = [{transform_indices = @transform_0, window_bounds = array<i64: 1, 128>}, {transform_indices = @transform_1, window_bounds = array<i64: 128, 8>}, {pipeline_mode = #tpu.pipeline_mode<synchronous>, transform_indices = @transform_2, window_bounds = array<i64: 8, 128>}, {pipeline_mode = #tpu.pipeline_mode<synchronous>, transform_indices = @transform_3, window_bounds = array<i64: 128, 128>}, {pipeline_mode = #tpu.pipeline_mode<synchronous>, transform_indices = @transform_4, window_bounds = array<i64: 1, 128>}, {transform_indices = @transform_5, window_bounds = array<i64: 1, 8, 128>}, {transform_indices = @transform_6, window_bounds = array<i64: 1, 8, 1>}]} {
    %c0_i32 = arith.constant 0 : i32
    %0 = arith.cmpi eq, %arg1, %c0_i32 : i32
    %1 = arith.extui %0 : i1 to i32
    %c0_i32_0 = arith.constant 0 : i32
    %2 = arith.cmpi ne, %1, %c0_i32_0 : i32
    scf.if %2 {
      %cst_27 = arith.constant 0.000000e+00 : f32
      %41 = vector.broadcast %cst_27 : f32 to vector<8x128xf32>
      %c0_28 = arith.constant 0 : index
      %c0_29 = arith.constant 0 : index
      %c0_30 = arith.constant 0 : index
      %42 = vector.load %arg7[%c0_28, %c0_29, %c0_30] : memref<1x8x128xf32, #tpu.memory_space<vmem>>, vector<1x8x128xf32>
      %43 = vector.shape_cast %42 : vector<1x8x128xf32> to vector<8x128xf32>
      %44 = vector.shape_cast %41 : vector<8x128xf32> to vector<1x8x128xf32>
      tpu.vector_store %arg7[%c0_28, %c0_29, %c0_30], %44 {strides = array<i32>} : memref<1x8x128xf32, #tpu.memory_space<vmem>>, vector<1x8x128xf32>,
      %cst_31 = arith.constant 0.000000e+00 : f32
      %45 = vector.broadcast %cst_31 : f32 to vector<8x1xf32>
      %c0_32 = arith.constant 0 : index
      %c0_33 = arith.constant 0 : index
      %c0_34 = arith.constant 0 : index
      %46 = vector.load %arg8[%c0_32, %c0_33, %c0_34] : memref<1x8x1xf32, #tpu.memory_space<vmem>>, vector<1x8x1xf32>
      %47 = vector.shape_cast %46 : vector<1x8x1xf32> to vector<8x1xf32>
      %48 = vector.shape_cast %45 : vector<8x1xf32> to vector<1x8x1xf32>
      tpu.vector_store %arg8[%c0_32, %c0_33, %c0_34], %48 {strides = array<i32>} : memref<1x8x1xf32, #tpu.memory_space<vmem>>, vector<1x8x1xf32>,
    } else {
    }
    %c0 = arith.constant 0 : index
    %c0_1 = arith.constant 0 : index
    %3 = vector.load %arg3[%c0, %c0_1] : memref<128x8xbf16, #tpu.memory_space<vmem>>, vector<128x8xbf16>
    %c0_2 = arith.constant 0 : index
    %c0_3 = arith.constant 0 : index
    %4 = vector.load %arg4[%c0_2, %c0_3] : memref<8x128xbf16, #tpu.memory_space<vmem>>, vector<8x128xbf16>
    %cst = arith.constant dense<0.000000e+00> : vector<128x128xf32>
    %5 = tpu.matmul %3, %4, %cst {dimension_numbers = #tpu.dot_dimension_numbers<[1], [0], [0], [1], [0, 0, 1, 1], [], []>} : vector<128x8xbf16>, vector<8x128xbf16>, vector<128x128xf32> -> vector<128x128xf32>
    %cst_4 = arith.constant 0.000000e+00 : f32
    %6 = vector.broadcast %cst_4 : f32 to vector<128x128xf32>
    %7 = arith.maximumf %5, %6 : vector<128x128xf32>
    %8 = arith.truncf %7 : vector<128x128xf32> to vector<128x128xbf16>
    %c0_5 = arith.constant 0 : index
    %c0_6 = arith.constant 0 : index
    %9 = vector.load %arg5[%c0_5, %c0_6] : memref<128x128xbf16, #tpu.memory_space<vmem>>, vector<128x128xbf16>
    %cst_7 = arith.constant dense<0.000000e+00> : vector<128x128xf32>
    %10 = tpu.matmul %8, %9, %cst_7 {dimension_numbers = #tpu.dot_dimension_numbers<[1], [0], [0], [1], [0, 0, 1, 1], [], []>} : vector<128x128xbf16>, vector<128x128xbf16>, vector<128x128xf32> -> vector<128x128xf32>
    %c0_8 = arith.constant 0 : index
    %c0_9 = arith.constant 0 : index
    %11 = vector.load %arg6[%c0_8, %c0_9] : memref<1x128xf32, #tpu.memory_space<vmem>>, vector<1x128xf32>
    %12 = vector.broadcast %11 : vector<1x128xf32> to vector<128x128xf32>
    %13 = arith.addf %10, %12 : vector<128x128xf32>
    %cst_10 = arith.constant 0.000000e+00 : f32
    %14 = vector.broadcast %cst_10 : f32 to vector<128x128xf32>
    %15 = arith.maximumf %13, %14 : vector<128x128xf32>
    %16 = tpu.iota {dimensions = array<i32: 0>} : vector<8x128xi32>
    %c0_11 = arith.constant 0 : index
    %c0_12 = arith.constant 0 : index
    %17 = vector.load %arg2[%c0_11, %c0_12] : memref<1x128xi32, #tpu.memory_space<vmem>>, vector<1x128xi32>
    %18 = vector.broadcast %17 : vector<1x128xi32> to vector<8x128xi32>
    %19 = arith.cmpi eq, %16, %18 : vector<8x128xi32>
    %c0_13 = arith.constant 0 : index
    %c0_14 = arith.constant 0 : index
    %c0_15 = arith.constant 0 : index
    %20 = vector.load %arg7[%c0_13, %c0_14, %c0_15] : memref<1x8x128xf32, #tpu.memory_space<vmem>>, vector<1x8x128xf32>
    %21 = vector.shape_cast %20 : vector<1x8x128xf32> to vector<8x128xf32>
    %22 = arith.extui %19 : vector<8x128xi1> to vector<8x128xi32>
    %23 = arith.sitofp %22 : vector<8x128xi32> to vector<8x128xf32>
    %24 = arith.truncf %23 : vector<8x128xf32> to vector<8x128xbf16>
    %25 = arith.truncf %15 : vector<128x128xf32> to vector<128x128xbf16>
    %cst_16 = arith.constant dense<0.000000e+00> : vector<8x128xf32>
    %26 = tpu.matmul %24, %25, %cst_16 {dimension_numbers = #tpu.dot_dimension_numbers<[1], [0], [0], [1], [0, 0, 1, 1], [], []>} : vector<8x128xbf16>, vector<128x128xbf16>, vector<8x128xf32> -> vector<8x128xf32>
    %27 = arith.addf %21, %26 : vector<8x128xf32>
    %c0_17 = arith.constant 0 : index
    %c0_18 = arith.constant 0 : index
    %c0_19 = arith.constant 0 : index
    %28 = vector.load %arg7[%c0_17, %c0_18, %c0_19] : memref<1x8x128xf32, #tpu.memory_space<vmem>>, vector<1x8x128xf32>
    %29 = vector.shape_cast %28 : vector<1x8x128xf32> to vector<8x128xf32>
    %30 = vector.shape_cast %27 : vector<8x128xf32> to vector<1x8x128xf32>
    tpu.vector_store %arg7[%c0_17, %c0_18, %c0_19], %30 {strides = array<i32>} : memref<1x8x128xf32, #tpu.memory_space<vmem>>, vector<1x8x128xf32>,
    %c0_20 = arith.constant 0 : index
    %c0_21 = arith.constant 0 : index
    %c0_22 = arith.constant 0 : index
    %31 = vector.load %arg8[%c0_20, %c0_21, %c0_22] : memref<1x8x1xf32, #tpu.memory_space<vmem>>, vector<1x8x1xf32>
    %32 = vector.shape_cast %31 : vector<1x8x1xf32> to vector<8x1xf32>
    %33 = arith.extui %19 : vector<8x128xi1> to vector<8x128xi32>
    %34 = arith.sitofp %33 : vector<8x128xi32> to vector<8x128xf32>
    %cst_23 = arith.constant dense<0.000000e+00> : vector<8xf32>
    %35 = vector.multi_reduction <add>, %34, %cst_23 [1] : vector<8x128xf32> to vector<8xf32>
    %36 = vector.shape_cast %35 : vector<8xf32> to vector<8x1xf32>
    %37 = arith.addf %32, %36 : vector<8x1xf32>
    %c0_24 = arith.constant 0 : index
    %c0_25 = arith.constant 0 : index
    %c0_26 = arith.constant 0 : index
    %38 = vector.load %arg8[%c0_24, %c0_25, %c0_26] : memref<1x8x1xf32, #tpu.memory_space<vmem>>, vector<1x8x1xf32>
    %39 = vector.shape_cast %38 : vector<1x8x1xf32> to vector<8x1xf32>
    %40 = vector.shape_cast %37 : vector<8x1xf32> to vector<1x8x1xf32>
    tpu.vector_store %arg8[%c0_24, %c0_25, %c0_26], %40 {strides = array<i32>} : memref<1x8x1xf32, #tpu.memory_space<vmem>>, vector<1x8x1xf32>,
    return
  }
  func.func @transform_0(%arg0: i32, %arg1: i32) -> (i32, i32) {
    %c1_i32 = arith.constant 1 : i32
    %0 = arith.muli %arg0, %c1_i32 : i32
    %1 = arith.addi %0, %arg1 : i32
    %c0_i32 = arith.constant 0 : i32
    %c0_i32_0 = arith.constant 0 : i32
    return %c0_i32, %1 : i32, i32
  }
  func.func @transform_1(%arg0: i32, %arg1: i32) -> (i32, i32) {
    %c1_i32 = arith.constant 1 : i32
    %0 = arith.muli %arg0, %c1_i32 : i32
    %1 = arith.addi %0, %arg1 : i32
    %c0_i32 = arith.constant 0 : i32
    %c0_i32_0 = arith.constant 0 : i32
    return %1, %c0_i32 : i32, i32
  }
  func.func @transform_2(%arg0: i32, %arg1: i32) -> (i32, i32) {
    %c0_i32 = arith.constant 0 : i32
    %c0_i32_0 = arith.constant 0 : i32
    %c0_i32_1 = arith.constant 0 : i32
    return %c0_i32, %c0_i32_0 : i32, i32
  }
  func.func @transform_3(%arg0: i32, %arg1: i32) -> (i32, i32) {
    %c0_i32 = arith.constant 0 : i32
    %c0_i32_0 = arith.constant 0 : i32
    %c0_i32_1 = arith.constant 0 : i32
    return %c0_i32, %c0_i32_0 : i32, i32
  }
  func.func @transform_4(%arg0: i32, %arg1: i32) -> (i32, i32) {
    %c0_i32 = arith.constant 0 : i32
    %c0_i32_0 = arith.constant 0 : i32
    %c0_i32_1 = arith.constant 0 : i32
    return %c0_i32, %c0_i32_0 : i32, i32
  }
  func.func @transform_5(%arg0: i32, %arg1: i32) -> (i32, i32, i32) {
    %c0_i32 = arith.constant 0 : i32
    %c0_i32_0 = arith.constant 0 : i32
    %c0_i32_1 = arith.constant 0 : i32
    return %arg0, %c0_i32, %c0_i32_0 : i32, i32, i32
  }
  func.func @transform_6(%arg0: i32, %arg1: i32) -> (i32, i32, i32) {
    %c0_i32 = arith.constant 0 : i32
    %c0_i32_0 = arith.constant 0 : i32
    %c0_i32_1 = arith.constant 0 : i32
    return %arg0, %c0_i32, %c0_i32_0 : i32, i32, i32
  }
}

</mosaic_0001>

<bundles_post_ra>
// kernel: tpu_custom_call.1
= control target key start
LH: loop header
LB: loop body
LE: loop exit
PB: predicated region body
PF: predicated region fallthrough
CT: control target
= control target key end

     0   :  { %12 = vsyncpa [#allocation3], 0  ;;  %s1413_s0 = inlined_call_operand.vmem [shape: s32[1,256], index: 0, kind: input, shape index: {}]   ;;  %s1414_s1 = inlined_call_operand.vmem [shape: bf16[256,8], index: 1, kind: input, shape index: {}]   ;;  %s1415_s2 = inlined_call_operand.vmem [shape: bf16[8,128], index: 2, kind: input, shape index: {}]   ;;  %s1416_s3 = inlined_call_operand.vmem [shape: bf16[128,128], index: 3, kind: input, shape index: {}]   ;;  %s1417_s4 = inlined_call_operand.vmem [shape: f32[1,128], index: 4, kind: input, shape index: {}]   ;;  %s1418_s5 = inlined_call_operand.hbm [shape: f32[2,8,128], index: 5, kind: output, shape index: {0}]   ;;  %s1419_s6 = inlined_call_operand.vmem [shape: f32[2,8,1], index: 6, kind: output, shape index: {1}]  }
   0x1   :  { %14 = vsyncpa [#allocation3 + $0x1], 0  ;;  %s1229_s21 = smov 0   ;;  %s1231_s22 = smov 0  }
   0x2   :  { %s1233_s23 = smov 0   ;;  %s1235_s24 = smov 0  }
   0x3   :  { %s1237_s25 = smov 0   ;;  %s1239_s26 = smov 0  }
   0x4 LB: > { %s891_s27 = sadd.s32 4294967295, %s1188_s26   ;;  %s892_s28 = sadd.s32 4294967294, %s1188_s26   ;;  %s1188_s26 = sphi %s1239_s26, %s20_s26   ;;  %s1184_s25 = sphi %s1237_s25, %s1426_s25   ;;  %s1180_s24 = sphi %s1235_s24, %s1425_s24   ;;  %s1176_s23 = sphi %s1233_s23, %s1424_s23   ;;  %s1172_s22 = sphi %s1231_s22, %s1423_s22   ;;  %s1168_s21 = sphi %s1229_s21, %s1422_s21  }
   0x5   : > { %s32_s29 = sadd.s32 1, %s1184_s25  ;;  %s158_s30 = sadd.s32 1, %s1176_s23 }
   0x6   : > { %p34_p0 = scmp.ge.s32.totalorder %s32_s29, 2  ;;  %p168_p1 = scmp.ne.s32.totalorder %s1176_s23, %s1172_s22 }
   0x7   : > { %p169_p2 = scmp.eq.s32.totalorder %s891_s27, 1  ;;  %p174_p3 = scmp.ne.s32.totalorder %s1172_s22, %s1168_s21 }
   0x8   : > { %s1428_s29 = smov (%p34_p0, %s32_s29), 0  ;;  %p175_p5 = scmp.eq.s32.totalorder %s892_s28, 1 }
   0x9   : > { %p1269_p4 = por %p169_p2, %p168_p1  ;;  %s155_s8 = ssub.s32 %s1184_s25, %s1428_s29 }
   0xa   : > { %p895_p6 = scmp.ge.s32.totalorder %s1188_s26, 1  ;;  %p156_p7 = scmp.eq.s32.totalorder %s155_s8, 0 }
   0xb   : > { %p1276_p8 = por %p175_p5, %p174_p3  ;;  %p247_p9 = scmp.lt.s32.totalorder %s1188_s26, 3 }
   0xc   : > { %s1282_s10 = scalar_select %p156_p7, %s1176_s23, %s158_s30  }
   0xd   : > { %p248_p10 = pnand %p895_p6, %p247_p9 }
   0xe   : > { %s897_s13 = sshll.u32 (!%p248_p10), %s1180_s24, 4  ;;  %p287_p12 = scmp.lt.s32.totalorder (!%p248_p10), %s1180_s24, 1 }
   0xf   : > { %251 = sbr.rel (%p248_p10) target bundleno = 696 (0x2b8), region = 40  ;;  %p293_p11 = scmp.lt.s32.totalorder (!%p248_p10), %s897_s13, 31 }
  0x10   : > { %s277_s16 = sand.u32 (!%p248_p10), 1, %s1172_s22   ;;  %s930_s18 = sshll.u32 (!%p248_p10), %s1180_s24, 7 }
  0x11   : > { %s896_s17 = sshll.u32 (!%p248_p10), %s277_s16, 3  ;;  %s771_s8 = scalar_lea.sflag (!%p248_p10), [#allocation3], %s277_s16 }
  0x12   : > { %s279_s19 = scalar_lea.vmem (!%p248_p10), [#allocation2], %s896_s17 }
  0x13   : > { %s788_s27 = sshll.u32 (!%p248_p10), %s279_s19, 4  ;;  %s1369_s27 = int_to_ptr.vmem [resolvable:$true] %s788_s27 }
  0x14   : > { %v327_v0 = vld [vmem:[%s1415_s2] sm:$0xf]  ;;  %vm393_vm0 = vcmask 1043456   ;;  %v1104_v1 = vld [vmem:[%s1416_s3 + $0x38] sm:$0xff]   ;;  %v1105_v3 = vld [vmem:[%s1416_s3 + $0x30] sm:$0xff]   ;;  %s1430_s13 = smov (!%p293_p11, %s897_s13), 31  ;;  %v702_v59 = vlaneseq }
  0x15   : > { %1037 = vmatprep.subr.msk.bf16.mxu0 %vm393_vm0, %v327_v0  ;;  %v395_v2 = vsel %vm393_vm0, %v327_v0, 0  ;;  %985 = vmatprep.subr.bf16.mxu1 %v1104_v1  ;;  %v1106_v4 = vld [vmem:[%s1416_s3 + $0x28] sm:$0xff]   ;;  %s898_s20 = sshll.u32 %s1430_s13, 2  ;;  %vm368_vm1 = vcmask 64512   ;;  %v1107_v5 = vld [vmem:[%s1416_s3 + $0x20] sm:$0xff]   ;;  %v1108_v9 = vld [vmem:[%s1416_s3 + $0x18] sm:$0xff]  }
  0x16   : > { %968 = vmatpush3.bf16.msra.mxu0 %v395_v2  ;;  %986 = vmatpush3.bf16.msra.mxu1 %v1104_v1  ;;  %s296_s30 = scalar_lea.vmem %s1414_s1, %s898_s20  ;;  %v1109_v15 = vld [vmem:[%s1416_s3 + $0x10] sm:$0xff]   ;;  %v1110_v16 = vld [vmem:[%s1416_s3 + $0x8] sm:$0xff]   ;;  %v1111_v17 = vld [vmem:[%s1416_s3] sm:$0xff]   ;;  %v1190_v58 = vmov 0.0   ;;  %v1332_v60 = vshrl.u32 %v702_v59, 7  ;;  %vm1191_vm2 = vmmov 0  }
  0x17   : > { %987 = vmatprep.subr.bf16.mxu1 %v1105_v3  ;;  %v1096_v6 = vld [vmem:[%s296_s30] sm:$0xff]   ;;  %v1097_v7 = vld [vmem:[%s296_s30 + $0x8] sm:$0xff]   ;;  %v1098_v8 = vld [vmem:[%s296_s30 + $0x10] sm:$0xff]   ;;  %1017 = vmatprep.subr.bf16.mxu0 %v1190_v58  ;;  %s1326_s20 = scalar_select %p287_p12, %s1180_s24, 1  ;;  %vm309_vm5 = vcmask 7168  }
  0x18   : > { %969 = vmatprep.mubr.msk.bf16.mxu0 %vm368_vm1, %v1096_v6  ;;  %v1099_v10 = vld [vmem:[%s296_s30 + $0x18] sm:$0xff]   ;;  %v1100_v11 = vld [vmem:[%s296_s30 + $0x20] sm:$0xff]   ;;  %v1101_v12 = vld [vmem:[%s296_s30 + $0x28] sm:$0xff]   ;;  %s1112_s11 = scalar_lea.vmem %s1369_s27, 128  ;;  %s1193_s24 = smov [#allocation2]  }
  0x19   : > { %970 = vmatmul.mubr.msk.bf16.vlgmr.msra.gmra.mxu0 %vm368_vm1, %v1097_v7  ;;  %v1102_v13 = vld [vmem:[%s296_s30 + $0x30] sm:$0xff]   ;;  %v1103_v14 = vld [vmem:[%s296_s30 + $0x38] sm:$0xff]   ;;  %s289_s30 = scalar_lea.vmem %s1413_s0, %s1326_s20  ;;  %s899_s12 = sshll.u32 %s1326_s20, 3 }
  0x1a   : > { %988 = vmatpush3.bf16.msra.mxu1 %v1105_v3  ;;  %973 = vmatprep.mubr.msk.bf16.mxu0 %vm368_vm1, %v1098_v8  ;;  %v1334_v61 = vld [vmem:[%s289_s30] ss:$0 sm:$0xff]  ;;  %s302_s15 = scalar_lea.vmem %s1419_s6, %s899_s12  ;;  %s1367_s30 = scalar_lea.hbm %s1418_s5, %s930_s18 }
  0x1b   : > { %989 = vmatprep.subr.bf16.mxu1 %v1106_v4  ;;  %vm709_vm3 = vcmp.eq.s32.totalorder %v1332_v60, %v1334_v61  ;;  %310 = vst.msk [vmem:[%s302_s15] sm:$0xff] %vm309_vm5, %v1190_v58  ;;  %p1113_p13 = scmp.ne.s32.totalorder %s1369_s27, %s1112_s11  ;;  %s1116_s12 = sshll.u32 %s1193_s24, 4  ;;  %s1117_s12 = int_to_ptr.vmem [resolvable:$false] %s1116_s12 }
  0x1c   : > { %v926_v62 = vsel %vm709_vm3, 1.0, %v1190_v58  ;;  %vm927_vm4 = vmpackc.low %vm709_vm3, %vm709_vm3  ;;  %s1118_s13 = scalar_lea.vmem %s1117_s12, 256  ;;  %p1119_p2 = scmp.lt.s32.totalorder %s1369_s27, %s1117_s12 }
  0x1d   : > { %765 = vadd.xlane.f32.xlu0 %v926_v62  ;;  %p1114_p0 = pnand %p1113_p13, %p1269_p4  ;;  %p1120_p3 = scmp.lt.s32.totalorder %s1118_s13, %s1112_s11 }
  0x1e   : > { %990 = vmatpush3.bf16.msra.mxu1 %v1106_v4 }
  0x1f   : > { %991 = vmatprep.subr.bf16.mxu1 %v1107_v5  ;;  %p1115_p1 = pneg %p1114_p0  ;;  %p1121_p5 = por %p1120_p3, %p1119_p2 }
  0x21   : > { %974 = vmatmul.mubr.msk.bf16.gmra.mxu0 %vm368_vm1, %v1099_v10  ;;  %p1122_p6 = pnand %p1121_p5, %p1115_p1 }
  0x22   : > { %992 = vmatpush3.bf16.msra.mxu1 %v1107_v5  ;;  %977 = vmatprep.mubr.msk.bf16.mxu0 %vm368_vm1, %v1100_v11 }
  0x23   : > { %993 = vmatprep.subr.bf16.mxu1 %v1108_v9 }
  0x26   : > { %994 = vmatpush3.bf16.msra.mxu1 %v1108_v9 }
  0x27   : > { %995 = vmatprep.subr.bf16.mxu1 %v1109_v15 }
  0x29   : > { %978 = vmatmul.mubr.msk.bf16.gmra.mxu0 %vm368_vm1, %v1101_v12  ;;  %v916_v12 = vld [vmem:[%s1417_s4] ss:$0 sm:$0xff] }
  0x2a   : > { %981 = vmatprep.mubr.msk.bf16.mxu0 %vm368_vm1, %v1102_v13  ;;  %996 = vmatpush3.bf16.msra.mxu1 %v1109_v15 }
  0x2b   : > { %997 = vmatprep.subr.bf16.mxu1 %v1110_v16 }
  0x2e   : > { %998 = vmatpush3.bf16.msra.mxu1 %v1110_v16 }
  0x2f   : > { %999 = vmatprep.subr.bf16.mxu1 %v1111_v17 }
  0x31   : > { %982 = vmatmul.mubr.msk.bf16.gmra.mxu0 %vm368_vm1, %v1103_v14 }
  0x32   : > { %1000 = vmatpush3.bf16.msra.mxu1 %v1111_v17  ;;  %1033 = vmatprep.mubr.msk.bf16.mxu0 %vm1191_vm2, %v1190_v58 }
  0xa6   : > { %v766_v59 = vpop.xlane.xlu0 %765 }
  0xd9   : > { %v971_v18 = vpop.f32.mrf.mxu0 }
  0xda   : > { %v496_v25 = vmax.f32 %v971_v18, 0.0 }
  0xdb   : > { %v431_v19 = vpop.f32.mrf.mxu0 }
  0xdc   : > { %v494_v23 = vmax.f32 %v431_v19, 0.0 }
  0xdd   : > { %v972_v20 = vpop.f32.mrf.mxu0 }
  0xde   : > { %v497_v21 = vmax.f32 %v972_v20, 0.0 }
  0xdf   : > { %v434_v22 = vpop.f32.mrf.mxu0 }
  0xe0   : > { %v495_v24 = vmax.f32 %v434_v22, 0.0  ;;  %v511_v28 = vpack.c.bf16 %v497_v21, %v496_v25 }
  0xe1   : > { %v975_v26 = vpop.f32.mrf.mxu0 }
  0xe2   : > { %v510_v27 = vpack.c.bf16 %v495_v24, %v494_v23  ;;  %v500_v35 = vmax.f32 %v975_v26, 0.0 }
  0xe3   : > { %v447_v29 = vpop.f32.mrf.mxu0 }
  0xe4   : > { %1001 = vmatprep.mubr.bf16.mxu1 %v510_v27  ;;  %v498_v33 = vmax.f32 %v447_v29, 0.0 }
  0xe5   : > { %v976_v30 = vpop.f32.mrf.mxu0  ;;  %1002 = vmatmul.mubr.bf16.vlgmr.msra.gmra.mxu1 %v511_v28 }
  0xe6   : > { %v501_v31 = vmax.f32 %v976_v30, 0.0 }
  0xe7   : > { %v450_v32 = vpop.f32.mrf.mxu0 }
  0xe8   : > { %v499_v34 = vmax.f32 %v450_v32, 0.0  ;;  %v513_v38 = vpack.c.bf16 %v501_v31, %v500_v35 }
  0xe9   : > { %v979_v36 = vpop.f32.mrf.mxu0 }
  0xea   : > { %v512_v37 = vpack.c.bf16 %v499_v34, %v498_v33  ;;  %v504_v45 = vmax.f32 %v979_v36, 0.0 }
  0xeb   : > { %v463_v39 = vpop.f32.mrf.mxu0 }
  0xec   : > { %1005 = vmatprep.mubr.bf16.mxu1 %v512_v37  ;;  %v502_v43 = vmax.f32 %v463_v39, 0.0 }
  0xed   : > { %v980_v40 = vpop.f32.mrf.mxu0  ;;  %1006 = vmatmul.mubr.bf16.gmra.mxu1 %v513_v38 }
  0xee   : > { %v505_v41 = vmax.f32 %v980_v40, 0.0 }
  0xef   : > { %v466_v42 = vpop.f32.mrf.mxu0 }
  0xf0   : > { %v503_v44 = vmax.f32 %v466_v42, 0.0  ;;  %v515_v48 = vpack.c.bf16 %v505_v41, %v504_v45 }
  0xf1   : > { %v983_v46 = vpop.f32.mrf.mxu0 }
  0xf2   : > { %v514_v47 = vpack.c.bf16 %v503_v44, %v502_v43  ;;  %v508_v55 = vmax.f32 %v983_v46, 0.0 }
  0xf3   : > { %v479_v49 = vpop.f32.mrf.mxu0 }
  0xf4   : > { %1009 = vmatprep.mubr.bf16.mxu1 %v514_v47  ;;  %v506_v53 = vmax.f32 %v479_v49, 0.0 }
  0xf5   : > { %v984_v50 = vpop.f32.mrf.mxu0  ;;  %1010 = vmatmul.mubr.bf16.gmra.mxu1 %v515_v48 }
  0xf6   : > { %v509_v51 = vmax.f32 %v984_v50, 0.0 }
  0xf7   : > { %v482_v52 = vpop.f32.mrf.mxu0 }
  0xf8   : > { %v507_v54 = vmax.f32 %v482_v52, 0.0  ;;  %v517_v57 = vpack.c.bf16 %v509_v51, %v508_v55 }
  0xfa   : > { %v516_v56 = vpack.c.bf16 %v507_v54, %v506_v53 }
  0xfc   : > { %1013 = vmatprep.mubr.bf16.mxu1 %v516_v56  ;;  %v1192_v56 = vmov 1.0|1.0  }
  0xfd   : > { %1014 = vmatmul.mubr.bf16.gmra.mxu1 %v517_v57  ;;  %v764_v57 = vld [vmem:[%s302_s15] sm:$0xff] }
  0xfe   : > { %v767_v62 = vadd.f32 %v766_v59, %v764_v57 }
 0x100   : > { %769 = vst.msk [vmem:[%s302_s15] sm:$0xff] %vm309_vm5, %v767_v62 }
 0x1a5   : > { %v1003_v63 = vpop.f32.mrf.mxu1 }
 0x1a6   : > { %v632_v45 = vadd.f32 %v1003_v63, %v916_v12 }
 0x1a7   : > { %v623_v0 = vpop.f32.mrf.mxu1 }
 0x1a8   : > { %v688_v50 = vmax.f32 %v632_v45, 0.0  ;;  %v624_v51 = vadd.f32 %v916_v12, %v623_v0 }
 0x1a9   : > { %v1004_v1 = vpop.f32.mrf.mxu1 }
 0x1aa   : > { %v635_v42 = vadd.f32 %v1004_v1, %v916_v12  ;;  %v686_v54 = vmax.f32 %v624_v51, 0.0 }
 0x1ab   : > { %v626_v2 = vpop.f32.mrf.mxu1 }
 0x1ac   : > { %v689_v47 = vmax.f32 %v635_v42, 0.0  ;;  %v627_v48 = vadd.f32 %v916_v12, %v626_v2 }
 0x1ad   : > { %v1007_v3 = vpop.f32.mrf.mxu1 }
 0x1ae   : > { %v648_v35 = vadd.f32 %v1007_v3, %v916_v12  ;;  %v715_v52 = vpack.c.bf16 %v689_v47, %v688_v50  ;;  %v687_v53 = vmax.f32 %v627_v48, 0.0 }
 0x1af   : > { %v639_v4 = vpop.f32.mrf.mxu1 }
 0x1b0   : > { %v692_v40 = vmax.f32 %v648_v35, 0.0  ;;  %v640_v41 = vadd.f32 %v916_v12, %v639_v4  ;;  %v714_v55 = vpack.c.bf16 %v687_v53, %v686_v54 }
 0x1b1   : > { %v1008_v5 = vpop.f32.mrf.mxu1 }
 0x1b2   : > { %v651_v32 = vadd.f32 %v1008_v5, %v916_v12  ;;  %v690_v46 = vmax.f32 %v640_v41, 0.0 }
 0x1b3   : > { %v642_v6 = vpop.f32.mrf.mxu1 }
 0x1b4   : > { %v693_v37 = vmax.f32 %v651_v32, 0.0  ;;  %v643_v38 = vadd.f32 %v916_v12, %v642_v6 }
 0x1b5   : > { %v1011_v7 = vpop.f32.mrf.mxu1 }
 0x1b6   : > { %v664_v25 = vadd.f32 %v1011_v7, %v916_v12  ;;  %v717_v43 = vpack.c.bf16 %v693_v37, %v692_v40  ;;  %v691_v44 = vmax.f32 %v643_v38, 0.0 }
 0x1b7   : > { %v655_v8 = vpop.f32.mrf.mxu1 }
 0x1b8   : > { %v696_v30 = vmax.f32 %v664_v25, 0.0  ;;  %v656_v31 = vadd.f32 %v916_v12, %v655_v8  ;;  %v716_v49 = vpack.c.bf16 %v691_v44, %v690_v46 }
 0x1b9   : > { %v1012_v9 = vpop.f32.mrf.mxu1 }
 0x1ba   : > { %v667_v22 = vadd.f32 %v1012_v9, %v916_v12  ;;  %v694_v36 = vmax.f32 %v656_v31, 0.0 }
 0x1bb   : > { %v658_v10 = vpop.f32.mrf.mxu1 }
 0x1bc   : > { %v697_v27 = vmax.f32 %v667_v22, 0.0  ;;  %v659_v28 = vadd.f32 %v916_v12, %v658_v10 }
 0x1bd   : > { %v1015_v11 = vpop.f32.mrf.mxu1 }
 0x1be   : > { %v680_v14 = vadd.f32 %v1015_v11, %v916_v12  ;;  %v719_v33 = vpack.c.bf16 %v697_v27, %v696_v30  ;;  %v695_v34 = vmax.f32 %v659_v28, 0.0 }
 0x1bf   : > { %v671_v13 = vpop.f32.mrf.mxu1 }
 0x1c0   : > { %v700_v18 = vmax.f32 %v680_v14, 0.0  ;;  %v672_v19 = vadd.f32 %v916_v12, %v671_v13  ;;  %v718_v39 = vpack.c.bf16 %v695_v34, %v694_v36 }
 0x1c1   : > { %v1016_v15 = vpop.f32.mrf.mxu1 }
 0x1c2   : > { %v683_v16 = vadd.f32 %v1016_v15, %v916_v12  ;;  %v698_v26 = vmax.f32 %v672_v19, 0.0 }
 0x1c3   : > { %v674_v17 = vpop.f32.mrf.mxu1 }
 0x1c4   : > { %v701_v20 = vmax.f32 %v683_v16, 0.0  ;;  %v675_v21 = vadd.f32 %v916_v12, %v674_v17 }
 0x1c6   : > { %v721_v23 = vpack.c.bf16 %v701_v20, %v700_v18  ;;  %v699_v24 = vmax.f32 %v675_v21, 0.0 }
 0x1c8   : > { %1018 = vmatpush3.bf16.msra.mxu0 %v721_v23  ;;  %v720_v29 = vpack.c.bf16 %v699_v24, %v698_v26 }
 0x1c9   : > { %1019 = vmatprep.subr.bf16.mxu0 %v1190_v58 }
 0x1cc   : > { %1020 = vmatpush3.bf16.msra.mxu0 %v720_v29 }
 0x1cd   : > { %1021 = vmatprep.subr.bf16.mxu0 %v1190_v58 }
 0x1d0   : > { %1022 = vmatpush3.bf16.msra.mxu0 %v719_v33 }
 0x1d1   : > { %1023 = vmatprep.subr.bf16.mxu0 %v1190_v58 }
 0x1d4   : > { %1024 = vmatpush3.bf16.msra.mxu0 %v718_v39 }
 0x1d5   : > { %1025 = vmatprep.subr.bf16.mxu0 %v1190_v58 }
 0x1d8   : > { %1026 = vmatpush3.bf16.msra.mxu0 %v717_v43 }
 0x1d9   : > { %1027 = vmatprep.subr.bf16.mxu0 %v1190_v58 }
 0x1dc   : > { %1028 = vmatpush3.bf16.msra.mxu0 %v716_v49 }
 0x1dd   : > { %1029 = vmatprep.subr.bf16.mxu0 %v1190_v58 }
 0x1e0   : > { %1030 = vmatpush3.bf16.msra.mxu0 %v715_v52 }
 0x1e1   : > { %1031 = vmatprep.subr.bf16.mxu0 %v1190_v58 }
 0x1e4   : > { %1032 = vmatpush3.bf16.msra.mxu0 %v714_v55 }
 0x1e7   : > { %1034 = vmatmul.mubr.msk.bf16.vlgmr.msra.gmra.mxu0 %vm927_vm4, %v1192_v56 }
 0x2a7   : > { %v756_v60 = vpop.f32.mrf.mxu0 }
 0x2a8   : > { %763 = vst [vmem:[%s279_s19] sm:$0xff] %v756_v60 }
 0x2a9   : > { %v1035_v58 = vpop.f32.mrf.mxu0 }
 0x2ab   : > { %v759_v61 = vpop.f32.mrf.mxu0 }
 0x2ac   : > { %1125 = shalt.err (!%p1122_p6)
}
 0x2ad   : > { %s1126_s14 = scalar_lea.hbm %s1367_s30, 128  ;;  %s1130_s17 = scalar_lea.hbm %s1418_s5, 256 }
 0x2ae   : > { %p1127_p7 = scmp.ne.s32.totalorder %s1367_s30, %s1126_s14  ;;  %p1131_p11 = scmp.lt.s32.totalorder %s1367_s30, %s1418_s5 }
 0x2af   : > { %p1132_p12 = scmp.lt.s32.totalorder %s1130_s17, %s1126_s14 }
 0x2b0   : > { %p1128_p9 = pnand %p1127_p7, %p1269_p4 }
 0x2b1   : > { %p1133_p13 = por %p1132_p12, %p1131_p11 }
 0x2b2   : > { %p1129_p10 = pneg %p1128_p9 }
 0x2b4   : > { %p1134_p0 = pnand %p1133_p13, %p1129_p10 }
 0x2b6   : > { %1137 = shalt.err (!%p1134_p0)
}
 0x2b7   : > { %1038 = dma.vmem_to_hbm [thread:$0]  (%p1269_p4), %s1369_s27, 128, %s1367_s30, %s771_s8   ;;  %v1036_v63 = vpop.f32.mrf.mxu0 }
 0x2b8 PF: > { %p1044_p1 = scmp.ge.s32.totalorder %s1188_s26, 2  ;;  %s803_s28 = sand.u32 1, %s1168_s21  }
 0x2b9   : > { %s804_s20 = scalar_lea.sflag [#allocation3], %s803_s28 }
 0x2ba   : > { %p1041_p2 = pnand %p1044_p1, %p1276_p8 }
 0x2bc   : > { %p1042_p3 = pneg %p1041_p2 }
 0x2be   : > { %1163 = dma.done.wait (%p1042_p3), %s804_s20, 128  }
 0x2bf   : > { %1165 = vsyncadd (%p1042_p3), %s804_s20, 4294967168  ;;  %s20_s26 = sadd.s32 1, %s1188_s26   ;;  %s1422_s21 = smov %s1172_s22 }
 0x2c0   : > { %p17_p5 = scmp.ge.s32.totalorder %s20_s26, 4   ;;  %s1423_s22 = smov %s1176_s23 }
 0x2c1   : > { %s1424_s23 = smov %s1282_s10  ;;  %s1425_s24 = smov %s1184_s25 }
 0x2c2   : > { %s1426_s25 = smov %s1428_s29  ;;  %19 = sbr.rel (!%p17_p5) target bundleno = 4 (0x4), region = 94 }
 0x2c7   :  { %816 = vsyncpa [#allocation3], 1 }
 0x2c8   :  { %818 = vsyncpa [#allocation3 + $0x1], 1 }

</bundles_post_ra>
